<compile_context>
chip_gen: v5e
topology: v5e:2x2
jax: 0.10.0
libtpu: 0.0.40
codegen_flags: <defaults>
</compile_context>

<pallas_src>
import jax
import jax.numpy as jnp
from jax.experimental import pallas as pl
from jax.experimental.pallas import tpu as pltpu


def _round_up(x: int, m: int) -> int:
    return ((x + m - 1) // m) * m


def _round_down(x: int, m: int) -> int:
    return (x // m) * m


def _logistic_kernel(w_ref, xs_ref, out_ref):
    # w_ref:  (1, F)        -- resident in VMEM (constant block index)
    # xs_ref: (F, TILE_N)   -- native layout, samples on the lane axis
    # out_ref:(1, TILE_N)   -- lane-dense output tile
    logits = jnp.dot(
        w_ref[...], xs_ref[...], preferred_element_type=jnp.float32
    )
    out_ref[...] = jax.nn.sigmoid(logits).astype(out_ref.dtype)


# Per-xs-block VMEM budget.  8 MiB keeps the double-buffered xs at 16 MiB,
# which fits comfortably on v5e/v6e (128 MiB VMEM) and on v7x (64 MiB VMEM)
# while being large enough to amortize per-grid-step overhead even at tiny F.
_XS_BLOCK_BUDGET_BYTES = 8 << 20


def simple_text_logistic_forward(xs, weight):
    """xs: (n_features, n_samples), weight: (1, n_features) -> (n_samples, 1)."""
    n_features, n_samples = xs.shape
    bytes_per_col = 4 * n_features  # f32 xs column

    # --- tile_n: VMEM-budget-derived, lane-aligned, megacore-friendly -------
    lanes_budget = max(128, _round_down(_XS_BLOCK_BUDGET_BYTES // bytes_per_col, 128))
    n_ceil = _round_up(max(n_samples, 1), 128)
    tile_n = min(lanes_budget, n_ceil)
    # Ensure >=2 grid steps whenever there is enough work, so the "parallel"
    # axis can shard across both TensorCores on v7x (harmless on v5e/v6e).
    if n_ceil >= 2 * 128:
        half = max(128, _round_up((n_ceil + 1) // 2, 128))
        tile_n = min(tile_n, half)

    grid = (pl.cdiv(n_samples, tile_n),)

    # --- VMEM limit: actual double-buffered footprint + slack ---------------
    xs_block_bytes = bytes_per_col * tile_n
    out_block_bytes = 4 * tile_n
    vmem_need = 2 * xs_block_bytes + 2 * out_block_bytes + 4 * n_features
    vmem_limit = int(vmem_need * 1.25) + (2 << 20)
    vmem_limit = max(16 << 20, min(vmem_limit, 48 << 20))

    out = pl.pallas_call(
        _logistic_kernel,
        out_shape=jax.ShapeDtypeStruct((1, n_samples), jnp.float32),
        grid=grid,
        in_specs=[
            # Weight: constant block index -> fetched once, stays in VMEM.
            pl.BlockSpec((1, n_features), lambda i: (0, 0)),
            # xs: tile the sample (lane) axis, keep features whole.  The last
            # block may be partial; its out-of-range lanes are don't-care.
            pl.BlockSpec((n_features, tile_n), lambda i: (0, i)),
        ],
        out_specs=pl.BlockSpec((1, tile_n), lambda i: (0, i)),
        compiler_params=pltpu.CompilerParams(
            dimension_semantics=("parallel",),   # independent sample tiles
            vmem_limit_bytes=vmem_limit,
        ),
        cost_estimate=pl.CostEstimate(
            flops=2 * n_samples * n_features,
            transcendentals=2 * n_samples,       # sigmoid ~ exp + reciprocal
            bytes_accessed=n_samples * n_features * 4
            + n_features * 4
            + n_samples * 4,
        ),
    )(weight, xs)

    # (1, n_samples) -> (n_samples, 1): trivial JAX-level reshape.
    return out.reshape(n_samples, 1)


def reference_forward(xs, weight):
    return jax.nn.sigmoid(xs.T @ weight.T)


if __name__ == "__main__":
    n_features = 32   # self.n_features = data_handler.predictors['xs'].shape[0]

    key = jax.random.PRNGKey(0)
    k_x, k_w = jax.random.split(key)

    # torch.nn.Linear(n_features, 1, bias=False).weight has shape (1, n_features);
    # emulate its uniform(-1/sqrt(F), 1/sqrt(F)) init deterministically.
    bound = 1.0 / (n_features ** 0.5)
    weight = jax.random.uniform(
        k_w, (1, n_features), dtype=jnp.float32, minval=-bound, maxval=bound
    )

    # Exercise both code paths: a tiny unaligned N (single partial block) and a
    # larger unaligned N (multi-step grid + partial last block).
    for n_samples in (8, 300):
        xs = jax.random.normal(k_x, (n_features, n_samples), dtype=jnp.float32)

        y_pred = simple_text_logistic_forward(xs, weight)
        y_pred = jax.block_until_ready(y_pred)

        y_ref = reference_forward(xs, weight)
        assert y_pred.shape == (n_samples, 1)
        assert jnp.allclose(y_pred, y_ref, atol=1e-6, rtol=1e-6)

    print("KERNEL_OK")
</pallas_src>

<mosaic_0001>
module attributes {stable_mosaic.version = 11 : i64} {
  func.func @_logistic_kernel(%arg0: i32, %arg1: memref<1x32xf32, #tpu.memory_space<vmem>>, %arg2: memref<32x128xf32, #tpu.memory_space<vmem>>, %arg3: memref<1x128xf32, #tpu.memory_space<vmem>>) attributes {dimension_semantics = [#tpu.dimension_semantics<parallel>], iteration_bounds = array<i64: 1>, scalar_prefetch = 0 : i64, scratch_operands = 0 : i64, tpu.core_type = #tpu.core_type<tc>, window_params = [{pipeline_mode = #tpu.pipeline_mode<synchronous>, transform_indices = @transform_0, window_bounds = array<i64: 1, 32>}, {transform_indices = @transform_1, window_bounds = array<i64: 32, 128>}, {transform_indices = @transform_2, window_bounds = array<i64: 1, 128>}]} {
    %c0 = arith.constant 0 : index
    %c0_0 = arith.constant 0 : index
    %0 = vector.load %arg1[%c0, %c0_0] : memref<1x32xf32, #tpu.memory_space<vmem>>, vector<1x32xf32>
    %c0_1 = arith.constant 0 : index
    %c0_2 = arith.constant 0 : index
    %1 = vector.load %arg2[%c0_1, %c0_2] : memref<32x128xf32, #tpu.memory_space<vmem>>, vector<32x128xf32>
    %cst = arith.constant dense<0.000000e+00> : vector<1x128xf32>
    %2 = tpu.matmul %0, %1, %cst {dimension_numbers = #tpu.dot_dimension_numbers<[1], [0], [0], [1], [0, 0, 1, 1], [], []>} : vector<1x32xf32>, vector<32x128xf32>, vector<1x128xf32> -> vector<1x128xf32>
    %3 = arith.negf %2 : vector<1x128xf32>
    %4 = math.exp %3 : vector<1x128xf32>
    %cst_3 = arith.constant 1.000000e+00 : f32
    %5 = vector.broadcast %cst_3 : f32 to vector<1x128xf32>
    %6 = arith.addf %5, %4 : vector<1x128xf32>
    %7 = arith.divf %5, %6 : vector<1x128xf32>
    %c0_4 = arith.constant 0 : index
    %c0_5 = arith.constant 0 : index
    %8 = vector.load %arg3[%c0_4, %c0_5] : memref<1x128xf32, #tpu.memory_space<vmem>>, vector<1x128xf32>
    tpu.vector_store %arg3[%c0_4, %c0_5], %7 {strides = array<i32>} : memref<1x128xf32, #tpu.memory_space<vmem>>, vector<1x128xf32>,
    return
  }
  func.func @transform_0(%arg0: i32) -> (i32, i32) {
    %c0_i32 = arith.constant 0 : i32
    %c0_i32_0 = arith.constant 0 : i32
    %c0_i32_1 = arith.constant 0 : i32
    return %c0_i32, %c0_i32_0 : i32, i32
  }
  func.func @transform_1(%arg0: i32) -> (i32, i32) {
    %c0_i32 = arith.constant 0 : i32
    %c0_i32_0 = arith.constant 0 : i32
    return %c0_i32, %arg0 : i32, i32
  }
  func.func @transform_2(%arg0: i32) -> (i32, i32) {
    %c0_i32 = arith.constant 0 : i32
    %c0_i32_0 = arith.constant 0 : i32
    return %c0_i32, %arg0 : i32, i32
  }
}

</mosaic_0001>

<bundles_post_ra>
// kernel: tpu_custom_call.1
= control target key start
LH: loop header
LB: loop body
LE: loop exit
PB: predicated region body
PF: predicated region fallthrough
CT: control target
= control target key end

     0   :  { %s144_s0 = inlined_call_operand.vmem [shape: f32[1,32], index: 0, kind: input, shape index: {}]   ;;  %s145_s1 = inlined_call_operand.vmem [shape: f32[32,8], index: 1, kind: input, shape index: {}]   ;;  %s146_s2 = inlined_call_operand.hbm [shape: f32[1,8], index: 2, kind: output, shape index: {}]  }
   0x1   :  { %v16_v0 = vld [vmem:[%s145_s1 + $0x18] sm:$0xff]  ;;  %v15_v1 = vld [vmem:[%s145_s1 + $0x10] sm:$0xff] }
   0x2   :  { %33 = vmatpush.msra.mxu0 %v16_v0 }
   0x3   :  { %7 = vsyncpa [#allocation3], 0  ;;  %v14_v2 = vld [vmem:[%s145_s1 + $0x8] sm:$0xff]  ;;  %v13_v3 = vld [vmem:[%s145_s1] sm:$0xff]  ;;  %vm17_vm0 = vcmask 261120   ;;  %s110_s1 = smov [#allocation2]  }
   0x4   :  { %34 = vmatpush.msra.mxu0 %v15_v1  ;;  %v12_v4 = vld [vmem:[%s144_s0] sm:$0x1]  ;;  %s66_s19 = sshll.u32 %s110_s1, 4  ;;  %s68_s21 = sshll.u32 %s146_s2, 4  ;;  %s67_s19 = int_to_ptr.vmem [resolvable:$true] %s66_s19  ;;  %s69_s21 = int_to_ptr.hbm [resolvable:$true] %s68_s21 }
   0x6   :  { %35 = vmatpush.msra.mxu0 %v14_v2 }
   0x8   :  { %36 = vmatpush.msra.mxu0 %v13_v3 }
   0x9   :  { %77 = vmatmul.msk.f32.vlgmr.msra.gmra.mxu0 %vm17_vm0, %v12_v4 }
  0x86   :  { %v38_v5 = vpop.f32.mrf.mxu0 }
  0x87   :  { %v78_v6 = vmul.f32 -1.442695, %v38_v5 }
  0x89   :  { %80 = vpow2.f32 %v78_v6 }
  0x8f   :  { %v81_v7 = vpop.eup %80 }
  0x90   :  { %v44_v8 = vadd.f32 1.0, %v81_v7 }
  0x92   :  { %82 = vrcp.f32 %v44_v8  ;;  %v56_v12 = vand.u32 2147483648, %v44_v8  ;;  %v54_v14 = vand.u32 2147483647, %v44_v8  ;;  %vm50_vm2 = vweird.f32 %v44_v8 }
  0x94   :  { %v57_v16 = vor.u32 1.1754944e-38, %v56_v12  ;;  %vm55_vm4 = vcmp.eq.f32.partialorder %v54_v14, 8.507059e+37 }
  0x98   :  { %v83_v9 = vpop.eup %82 }
  0x99   :  { %v46_v10 = vmul.f32 %v83_v9, %v44_v8  ;;  %vm51_vm1 = vweird.f32 %v83_v9 }
  0x9a   :  { %vm52_vm3 = vmor %vm50_vm2, %vm51_vm1 }
  0x9b   :  { %v47_v11 = vsub.f32 1.0, %v46_v10 }
  0x9d   :  { %v48_v13 = vmul.f32 %v83_v9, %v47_v11 }
  0x9f   :  { %v49_v15 = vadd.f32 %v83_v9, %v48_v13 }
  0xa1   :  { %v53_v17 = vsel %vm52_vm3, %v83_v9, %v49_v15 }
  0xa2   :  { %v58_v18 = vsel %vm55_vm4, %v57_v16, %v53_v17 }
  0xa3   :  { %60 = vst [vmem:[#allocation2] sm:$0x1] %v58_v18 }
  0xa4   :  { %71 = dma.vmem_to_hbm [thread:$0]  %s67_s19, 16, %s69_s21, [#allocation3]  }
  0xa5   :  { %108 = dma.done.wait [#allocation3], 16  }
  0xa6   :  { %109 = vsyncadd [#allocation3], 4294967280 }
  0xa7   :  { %76 = vsyncpa [#allocation3], 1 }

</bundles_post_ra>
